<compile_context>
chip_gen: v7x
topology: tpu7x:2x2x1
jax: 0.10.0
libtpu: 0.0.40
codegen_flags: <defaults>
</compile_context>

<pallas_src>
import numpy as np
import jax
import jax.numpy as jnp
from jax.experimental import pallas as pl
from jax.experimental.pallas import tpu as pltpu

# ---------------- module hyper-parameters (defaults of tripletLoss.__init__) ----
S_FEAT = 7        # feature_size
B_BOX = 2         # num_bboxes
N_CLS = 30        # num_classes
BETA = 64         # embedding length
GAMMA = 1         # embedding identifier length
N_COL = 5 * B_BOX + N_CLS          # = 40, start of embedding in pred / label col in target
MARGIN = 1.0
EPS = 1e-6        # torch.pairwise_distance default eps


# ---------------- Pallas kernel: vectorized triplet margin loss ----------------
def triplet_margin_loss_pallas(emb, idx_all, weights):
    """emb:     (M, beta)      float32 flattened embeddings
       idx_all: (3*K_pad, 1)   int32 row indices, stacked [anchor; positive; negative]
       weights: (K_pad, 1)     float32, 1/K for valid triplets, 0 for pad rows

    Returns scalar mean(max(||a-p+eps||_2 - ||a-n+eps||_2 + margin, 0)) over valid triplets.
    """
    M, beta = emb.shape
    K3 = int(idx_all.shape[0])
    K_pad = int(weights.shape[0])

    def kernel(idx_ref, w_ref, emb_ref, out_ref):
        idx = idx_ref[...]                                             # (3*K_pad, 1) int32
        # One-hot gather of all 3*K_pad rows in a single MXU matmul.
        col = jax.lax.broadcasted_iota(jnp.int32, (K3, M), 1)          # (3*K_pad, M)
        onehot = (col == idx).astype(jnp.float32)
        rows = jnp.dot(onehot, emb_ref[...],
                       preferred_element_type=jnp.float32)             # (3*K_pad, beta)

        a = rows[:K_pad]                                               # (K_pad, beta)
        p = rows[K_pad:2 * K_pad]
        n = rows[2 * K_pad:]

        d_ap = jnp.sqrt(jnp.sum((a - p + EPS) ** 2, axis=-1, keepdims=True))  # (K_pad, 1)
        d_an = jnp.sqrt(jnp.sum((a - n + EPS) ** 2, axis=-1, keepdims=True))  # (K_pad, 1)
        hinge = jnp.maximum(d_ap - d_an + MARGIN, 0.0)                         # (K_pad, 1)

        # Weighted sum == mean over the K valid triplets (pad rows have weight 0).
        out_ref[...] = jnp.sum(hinge * w_ref[...], axis=0, keepdims=True)      # (1, 1)

    out = pl.pallas_call(
        kernel,
        out_shape=jax.ShapeDtypeStruct((1, 1), jnp.float32),
        grid=(1,),
        in_specs=[
            pl.BlockSpec((K3, 1), lambda i: (0, 0)),
            pl.BlockSpec((K_pad, 1), lambda i: (0, 0)),
            pl.BlockSpec((M, beta), lambda i: (0, 0)),
        ],
        out_specs=pl.BlockSpec((1, 1), lambda i: (0, 0)),
        compiler_params=pltpu.CompilerParams(
            dimension_semantics=("arbitrary",)),
    )(idx_all, weights, emb)
    return out[0, 0]


# ---------------- JAX glue reproducing tripletLoss.forward ---------------------
def triplet_loss_forward(pred, target, num_triplets):
    """pred: (b,S,S,5B+C+beta), target: (b,S,S,5B+C+gamma).

    `num_triplets` is the static count of anchor/positive/negative cells and must
    equal the runtime count (as in the PyTorch module, which requires the three
    role counts to match)."""
    b = pred.shape[0]
    M = b * S_FEAT * S_FEAT
    pred_flat = pred.reshape(M, pred.shape[-1])
    targ_flat = target.reshape(M, target.shape[-1])

    conf = targ_flat[:, 4] > 0
    lab = targ_flat[:, N_COL]
    a_mask = (lab == 1) & conf
    p_mask = (lab == 2) & conf
    n_mask = (lab == 3) & conf

    K = int(num_triplets)
    if K == 0:
        # PyTorch's mean over an empty set is NaN.
        return jnp.float32(jnp.nan)
    K_pad = ((K + 7) // 8) * 8     # round up to sublane multiple

    # static-size compaction; order matches PyTorch boolean indexing (row-major scan).
    # Pad rows point at row 0 but are masked out of the reduction via `weights`.
    a_idx = jnp.nonzero(a_mask, size=K_pad, fill_value=0)[0].astype(jnp.int32)
    p_idx = jnp.nonzero(p_mask, size=K_pad, fill_value=0)[0].astype(jnp.int32)
    n_idx = jnp.nonzero(n_mask, size=K_pad, fill_value=0)[0].astype(jnp.int32)
    idx_all = jnp.concatenate([a_idx, p_idx, n_idx]).reshape(3 * K_pad, 1)

    weights = jnp.where(jnp.arange(K_pad) < K, 1.0 / K, 0.0)
    weights = weights.astype(jnp.float32).reshape(K_pad, 1)

    emb = pred_flat[:, N_COL:].astype(jnp.float32)     # (M, beta)
    return triplet_margin_loss_pallas(emb, idx_all, weights)


# ---------------- numpy reference (mirrors the PyTorch forward) ----------------
def numpy_reference(pred, target):
    pred = np.asarray(pred)
    target = np.asarray(target)
    lab = target[..., N_COL]
    conf = target[..., 4]
    a = pred[(lab == 1) & (conf > 0)][:, N_COL:]
    p = pred[(lab == 2) & (conf > 0)][:, N_COL:]
    n = pred[(lab == 3) & (conf > 0)][:, N_COL:]
    d_ap = np.sqrt(((a - p + EPS) ** 2).sum(-1))
    d_an = np.sqrt(((a - n + EPS) ** 2).sum(-1))
    return np.maximum(d_ap - d_an + MARGIN, 0.0).mean()


if __name__ == "__main__":
    key = jax.random.PRNGKey(0)
    k1, k2 = jax.random.split(key)

    batch = 2
    D_pred = 5 * B_BOX + N_CLS + BETA     # 104
    D_targ = 5 * B_BOX + N_CLS + GAMMA    # 41

    pred = jax.random.normal(k1, (batch, S_FEAT, S_FEAT, D_pred), dtype=jnp.float32)

    # target: random boxes/classes, zero embedding-identifier column, then plant
    # K triplets (anchor=1, positive=2, negative=3) with confidence > 0.
    target = jax.random.uniform(k2, (batch, S_FEAT, S_FEAT, D_targ), dtype=jnp.float32)
    target = target.at[..., N_COL].set(0.0)

    K = 4
    anchor_cells = np.array([3, 20, 55, 80])     # flat indices into (batch*S*S)
    pos_cells = np.array([5, 25, 60, 85])
    neg_cells = np.array([10, 30, 65, 90])

    t_flat = target.reshape(batch * S_FEAT * S_FEAT, D_targ)
    for cells, tag in ((anchor_cells, 1.0), (pos_cells, 2.0), (neg_cells, 3.0)):
        t_flat = t_flat.at[cells, N_COL].set(tag)
        t_flat = t_flat.at[cells, 4].set(1.0)
    target = t_flat.reshape(batch, S_FEAT, S_FEAT, D_targ)

    loss = triplet_loss_forward(pred, target, num_triplets=K)
    loss = jax.block_until_ready(loss)

    ref = numpy_reference(pred, target)
    np.testing.assert_allclose(np.asarray(loss), ref, rtol=1e-5, atol=1e-5)

    print("KERNEL_OK")
</pallas_src>

<mosaic_0001>
module attributes {stable_mosaic.version = 11 : i64} {
  func.func @kernel(%arg0: i32, %arg1: memref<24x1xi32, #tpu.memory_space<vmem>>, %arg2: memref<8x1xf32, #tpu.memory_space<vmem>>, %arg3: memref<98x64xf32, #tpu.memory_space<vmem>>, %arg4: memref<1x1xf32, #tpu.memory_space<vmem>>) attributes {dimension_semantics = [#tpu.dimension_semantics<arbitrary>], iteration_bounds = array<i64: 1>, scalar_prefetch = 0 : i64, scratch_operands = 0 : i64, tpu.core_type = #tpu.core_type<tc>, window_params = [{pipeline_mode = #tpu.pipeline_mode<synchronous>, transform_indices = @transform_0, window_bounds = array<i64: 24, 1>}, {pipeline_mode = #tpu.pipeline_mode<synchronous>, transform_indices = @transform_1, window_bounds = array<i64: 8, 1>}, {pipeline_mode = #tpu.pipeline_mode<synchronous>, transform_indices = @transform_2, window_bounds = array<i64: 98, 64>}, {pipeline_mode = #tpu.pipeline_mode<synchronous>, transform_indices = @transform_3, window_bounds = array<i64: 1, 1>}]} {
    %c0 = arith.constant 0 : index
    %c0_0 = arith.constant 0 : index
    %0 = vector.load %arg1[%c0, %c0_0] : memref<24x1xi32, #tpu.memory_space<vmem>>, vector<24x1xi32>
    %1 = tpu.iota {dimensions = array<i32: 1>} : vector<24x98xi32>
    %2 = vector.broadcast %0 : vector<24x1xi32> to vector<24x98xi32>
    %3 = arith.cmpi eq, %1, %2 : vector<24x98xi32>
    %4 = arith.extui %3 : vector<24x98xi1> to vector<24x98xi32>
    %5 = arith.sitofp %4 : vector<24x98xi32> to vector<24x98xf32>
    %c0_1 = arith.constant 0 : index
    %c0_2 = arith.constant 0 : index
    %6 = vector.load %arg3[%c0_1, %c0_2] : memref<98x64xf32, #tpu.memory_space<vmem>>, vector<98x64xf32>
    %cst = arith.constant dense<0.000000e+00> : vector<24x64xf32>
    %7 = tpu.matmul %5, %6, %cst {dimension_numbers = #tpu.dot_dimension_numbers<[1], [0], [0], [1], [0, 0, 1, 1], [], []>} : vector<24x98xf32>, vector<98x64xf32>, vector<24x64xf32> -> vector<24x64xf32>
    %8 = vector.extract_strided_slice %7 {offsets = [0, 0], sizes = [8, 64], strides = [1, 1]} : vector<24x64xf32> to vector<8x64xf32>
    %9 = vector.extract_strided_slice %7 {offsets = [8, 0], sizes = [8, 64], strides = [1, 1]} : vector<24x64xf32> to vector<8x64xf32>
    %10 = vector.extract_strided_slice %7 {offsets = [16, 0], sizes = [8, 64], strides = [1, 1]} : vector<24x64xf32> to vector<8x64xf32>
    %11 = arith.subf %8, %9 : vector<8x64xf32>
    %cst_3 = arith.constant 9.99999997E-7 : f32
    %12 = vector.broadcast %cst_3 : f32 to vector<8x64xf32>
    %13 = arith.addf %11, %12 : vector<8x64xf32>
    %14 = arith.mulf %13, %13 : vector<8x64xf32>
    %cst_4 = arith.constant dense<0.000000e+00> : vector<8xf32>
    %15 = vector.multi_reduction <add>, %14, %cst_4 [1] : vector<8x64xf32> to vector<8xf32>
    %16 = vector.shape_cast %15 : vector<8xf32> to vector<8x1xf32>
    %17 = math.sqrt %16 : vector<8x1xf32>
    %18 = arith.subf %8, %10 : vector<8x64xf32>
    %cst_5 = arith.constant 9.99999997E-7 : f32
    %19 = vector.broadcast %cst_5 : f32 to vector<8x64xf32>
    %20 = arith.addf %18, %19 : vector<8x64xf32>
    %21 = arith.mulf %20, %20 : vector<8x64xf32>
    %cst_6 = arith.constant dense<0.000000e+00> : vector<8xf32>
    %22 = vector.multi_reduction <add>, %21, %cst_6 [1] : vector<8x64xf32> to vector<8xf32>
    %23 = vector.shape_cast %22 : vector<8xf32> to vector<8x1xf32>
    %24 = math.sqrt %23 : vector<8x1xf32>
    %25 = arith.subf %17, %24 : vector<8x1xf32>
    %cst_7 = arith.constant 1.000000e+00 : f32
    %26 = vector.broadcast %cst_7 : f32 to vector<8x1xf32>
    %27 = arith.addf %25, %26 : vector<8x1xf32>
    %cst_8 = arith.constant 0.000000e+00 : f32
    %28 = vector.broadcast %cst_8 : f32 to vector<8x1xf32>
    %29 = arith.maximumf %27, %28 : vector<8x1xf32>
    %c0_9 = arith.constant 0 : index
    %c0_10 = arith.constant 0 : index
    %30 = vector.load %arg2[%c0_9, %c0_10] : memref<8x1xf32, #tpu.memory_space<vmem>>, vector<8x1xf32>
    %31 = arith.mulf %29, %30 : vector<8x1xf32>
    %cst_11 = arith.constant dense<0.000000e+00> : vector<1xf32>
    %32 = vector.multi_reduction <add>, %31, %cst_11 [0] : vector<8x1xf32> to vector<1xf32>
    %33 = vector.shape_cast %32 : vector<1xf32> to vector<1x1xf32>
    %c0_12 = arith.constant 0 : index
    %c0_13 = arith.constant 0 : index
    %34 = vector.load %arg4[%c0_12, %c0_13] : memref<1x1xf32, #tpu.memory_space<vmem>>, vector<1x1xf32>
    tpu.vector_store %arg4[%c0_12, %c0_13], %33 {strides = array<i32>} : memref<1x1xf32, #tpu.memory_space<vmem>>, vector<1x1xf32>,
    return
  }
  func.func @transform_0(%arg0: i32) -> (i32, i32) {
    %c0_i32 = arith.constant 0 : i32
    %c0_i32_0 = arith.constant 0 : i32
    %c0_i32_1 = arith.constant 0 : i32
    return %c0_i32, %c0_i32_0 : i32, i32
  }
  func.func @transform_1(%arg0: i32) -> (i32, i32) {
    %c0_i32 = arith.constant 0 : i32
    %c0_i32_0 = arith.constant 0 : i32
    %c0_i32_1 = arith.constant 0 : i32
    return %c0_i32, %c0_i32_0 : i32, i32
  }
  func.func @transform_2(%arg0: i32) -> (i32, i32) {
    %c0_i32 = arith.constant 0 : i32
    %c0_i32_0 = arith.constant 0 : i32
    %c0_i32_1 = arith.constant 0 : i32
    return %c0_i32, %c0_i32_0 : i32, i32
  }
  func.func @transform_3(%arg0: i32) -> (i32, i32) {
    %c0_i32 = arith.constant 0 : i32
    %c0_i32_0 = arith.constant 0 : i32
    %c0_i32_1 = arith.constant 0 : i32
    return %c0_i32, %c0_i32_0 : i32, i32
  }
}

</mosaic_0001>

<bundles_post_ra>
// kernel: tpu_custom_call.1
= control target key start
LH: loop header
LB: loop body
LE: loop exit
PB: predicated region body
PF: predicated region fallthrough
CT: control target
= control target key end

     0   :  { %v326_v2 = vmov 0   ;;  %v327_v9 = vmov 0.0|0.0   ;;  %s417_s0 = inlined_call_operand.vmem [shape: s32[24,1], index: 0, kind: input, shape index: {}]   ;;  %s418_s1 = inlined_call_operand.vmem [shape: f32[8,1], index: 1, kind: input, shape index: {}]   ;;  %s419_s2 = inlined_call_operand.vmem [shape: f32[98,64], index: 2, kind: input, shape index: {}]   ;;  %s420_s3 = inlined_call_operand.hbm [shape: f32[1,1], index: 3, kind: output, shape index: {}]  }
   0x1   :  { %v16_v0 = vld [vmem:[%s417_s0 + $0x8] sm:$0xff]  ;;  %v17_v1 = vld [vmem:[%s417_s0 + $0x10] sm:$0xff]  ;;  %296 = vset.pattern.permute.xlu0 %v326_v2  ;;  %297 = vset.pattern.permute.xlu1 %v326_v2  ;;  %v38_v3 = vld [vmem:[%s419_s2] sm:$0xff] }
   0x2   :  { %v39_v4 = vld [vmem:[%s419_s2 + $0x8] sm:$0xff]  ;;  %v40_v5 = vld [vmem:[%s419_s2 + $0x10] sm:$0xff]  ;;  %24 = vperm.xlu0 %296, %v16_v0   ;;  %27 = vperm.xlu1 %297, %v17_v1   ;;  %v41_v7 = vld [vmem:[%s419_s2 + $0x18] sm:$0xff] }
   0x3   :  { %v260_v6 = vpack.c.bf16 %v39_v4, %v38_v3  ;;  %v15_v8 = vld [vmem:[%s417_s0] sm:$0xff]  ;;  %277 = vmatprep.subr.bf16.mxu1 %v327_v9  ;;  %259 = vmatprep.subr.bf16.mxu0 %v327_v9  ;;  %v263_v10 = vpack.c.bf16 %v41_v7, %v40_v5  ;;  %v43_v12 = vld [vmem:[%s419_s2 + $0x28] sm:$0xff] }
   0x4   :  { %v42_v11 = vld [vmem:[%s419_s2 + $0x20] sm:$0xff] }
   0x5   :  { %284 = vmatpush3.bf16.msra.mxu1 %v260_v6  ;;  %261 = vmatpush3.bf16.msra.mxu0 %v260_v6 }
   0x6   :  { %278 = vmatprep.subr.bf16.mxu1 %v327_v9  ;;  %262 = vmatprep.subr.bf16.mxu0 %v327_v9 }
   0x7   :  { %8 = vsyncpa [#allocation3], 0  ;;  %21 = vperm.xlu0 %296, %v15_v8   ;;  %vm328_vm0 = vmmov 0   ;;  %v329_v13 = vmov 0.0   ;;  %v266_v14 = vpack.c.bf16 %v43_v12, %v42_v11  ;;  %v44_v15 = vld [vmem:[%s419_s2 + $0x30] sm:$0xff]  ;;  %v45_v16 = vld [vmem:[%s419_s2 + $0x38] sm:$0xff]  ;;  %v18_v25 = vlaneseq }
   0x8   :  { %253 = vmatprep.mubr.msk.f32.mxu1 %vm328_vm0, %v329_v13  ;;  %250 = vmatprep.mubr.msk.f32.mxu0 %vm328_vm0, %v329_v13  ;;  %v269_v17 = vpack.c.bf16 %v45_v16, %v44_v15  ;;  %v46_v18 = vld [vmem:[%s419_s2 + $0x40] sm:$0xff]  ;;  %v47_v19 = vld [vmem:[%s419_s2 + $0x48] sm:$0xff]  ;;  %v48_v21 = vld [vmem:[%s419_s2 + $0x50] sm:$0xff]  ;;  %vm61_vm1 = vcmask 1041408   ;;  %vm51_vm2 = vcmask 801792   ;;  %vm148_vm6 = vcmask 523264  }
   0x9   :  { %285 = vmatpush3.bf16.msra.mxu1 %v263_v10  ;;  %264 = vmatpush3.bf16.msra.mxu0 %v263_v10  ;;  %v272_v20 = vpack.c.bf16 %v47_v19, %v46_v18  ;;  %v49_v22 = vld [vmem:[%s419_s2 + $0x58] sm:$0xff]  ;;  %v50_v24 = vld [vmem:[%s419_s2 + $0x60] sm:$0x3]  ;;  %v19_v26 = vand.u32 127, %v18_v25  ;;  %vm177_vm11 = vcmask 7168   ;;  %s330_s17 = smov [#allocation2]  }
   0xa   :  { %279 = vmatprep.subr.bf16.mxu1 %v327_v9  ;;  %265 = vmatprep.subr.bf16.mxu0 %v327_v9  ;;  %v275_v23 = vpack.c.bf16 %v49_v22, %v48_v21  ;;  %v175_v61 = vld [vmem:[%s418_s1] sm:$0xff]  ;;  %s193_s18 = sshll.u32 %s330_s17, 4  ;;  %vm185_vm12 = vcmask 0   ;;  %s194_s18 = int_to_ptr.vmem [resolvable:$true] %s193_s18 }
   0xb   :  { %s302_s19 = scalar_lea.vmem %s194_s18, 16  ;;  %s306_s20 = scalar_lea.vmem %s194_s18, 32 }
   0xc   :  { %p303_p0 = scmp.ne.s32.totalorder %s194_s18, %s302_s19  ;;  %p307_p1 = scmp.lt.s32.totalorder %s194_s18, %s194_s18 }
   0xd   :  { %286 = vmatpush3.bf16.msra.mxu1 %v266_v14  ;;  %267 = vmatpush3.bf16.msra.mxu0 %v266_v14  ;;  %p308_p2 = scmp.lt.s32.totalorder %s306_s20, %s302_s19 }
   0xe   :  { %280 = vmatprep.subr.bf16.mxu1 %v327_v9  ;;  %268 = vmatprep.subr.bf16.mxu0 %v327_v9 }
   0xf   :  { %p309_p3 = por %p308_p2, %p307_p1 }
  0x11   :  { %287 = vmatpush3.bf16.msra.mxu1 %v269_v17  ;;  %270 = vmatpush3.bf16.msra.mxu0 %v269_v17  ;;  %p310_p4 = pnand %p309_p3, %p303_p0 }
  0x12   :  { %281 = vmatprep.subr.bf16.mxu1 %v327_v9  ;;  %271 = vmatprep.subr.bf16.mxu0 %v327_v9 }
  0x15   :  { %288 = vmatpush3.bf16.msra.mxu1 %v272_v20  ;;  %273 = vmatpush3.bf16.msra.mxu0 %v272_v20 }
  0x16   :  { %282 = vmatprep.subr.bf16.mxu1 %v327_v9  ;;  %274 = vmatprep.subr.bf16.mxu0 %v327_v9 }
  0x19   :  { %289 = vmatpush3.bf16.msra.mxu1 %v275_v23  ;;  %276 = vmatpush3.bf16.msra.mxu0 %v275_v23 }
  0x1a   :  { %283 = vmatprep.subr.mxu1 %v329_v13  ;;  %248 = vmatprep.subr.mxu0 %v329_v13 }
  0x1d   :  { %290 = vmatpush3.msk.msra.mxu1 %vm61_vm1, %v50_v24  ;;  %249 = vmatpush3.msk.msra.mxu0 %vm61_vm1, %v50_v24 }
  0x81   :  { %v25_v27 = vpop.permute.xlu0 %24  ;;  %v28_v28 = vpop.permute.xlu1 %27 }
  0x82   :  { %vm30_vm3 = vcmp.eq.s32.totalorder %v19_v26, %v25_v27  ;;  %vm31_vm4 = vcmp.eq.s32.totalorder %v19_v26, %v28_v28 }
  0x83   :  { %v202_v29 = vsel %vm30_vm3, 1.0, %v329_v13  ;;  %v203_v30 = vsel %vm31_vm4, 1.0, %v329_v13 }
  0x84   :  { %254 = vmatmul.mubr.msk.f32.vlgmr.msra.gmra.mrb[0].mxu1 %vm51_vm2, %v202_v29 }
  0x85   :  { %256 = vmatprep.mubr.msk.f32.mxu1 %vm328_vm0, %v329_v13 }
  0x86   :  { %v22_v31 = vpop.permute.xlu0 %21 }
  0x87   :  { %vm29_vm5 = vcmp.eq.s32.totalorder %v19_v26, %v22_v31 }
  0x88   :  { %v201_v32 = vsel %vm29_vm5, 1.0, %v329_v13  ;;  %257 = vmatmul.mubr.msk.f32.gmra.mrb[2].mxu1 %vm51_vm2, %v203_v30 }
  0x89   :  { %251 = vmatmul.mubr.msk.f32.vlgmr.msra.gmra.mrb[0].mxu0 %vm51_vm2, %v201_v32 }
 0x157   :  { %v136_v33 = vpop.f32.mrb[0].mxu1 }
 0x158   :  { %v255_v34 = vpop.f32.mrb[1].mxu1 }
 0x15b   :  { %v141_v36 = vpop.f32.mrb[2].mxu1 }
 0x15c   :  { %v131_v35 = vpop.f32.mrb[0].mxu0  ;;  %v258_v40 = vpop.f32.mrb[3].mxu1 }
 0x15d   :  { %v145_v37 = vsub.f32 %v131_v35, %v136_v33  ;;  %v159_v38 = vsub.f32 %v131_v35, %v141_v36  ;;  %v252_v39 = vpop.f32.mrb[1].mxu0 }
 0x15f   :  { %v146_v41 = vadd.f32 1e-06, %v145_v37  ;;  %v160_v42 = vadd.f32 1e-06, %v159_v38 }
 0x161   :  { %v161_v43 = vmul.f32 %v160_v42, %v160_v42  ;;  %v147_v44 = vmul.f32 %v146_v41, %v146_v41 }
 0x163   :  { %v162_v45 = vsel %vm148_vm6, %v161_v43, 0.0  ;;  %v149_v46 = vsel %vm148_vm6, %v147_v44, 0.0 }
 0x164   :  { %163 = vadd.xlane.f32.xlu0 %v162_v45  ;;  %150 = vadd.xlane.f32.xlu1 %v149_v46 }
 0x1f1   :  { %v164_v47 = vpop.xlane.xlu0 %163  ;;  %v151_v48 = vpop.xlane.xlu1 %150 }
 0x1f2   :  { %298 = vrsqrt.f32 %v164_v47  ;;  %vm167_vm7 = vcmp.eq.f32.partialorder %v164_v47, inf  ;;  %v170_v52 = vand.u32 2147483648, %v164_v47  ;;  %vm169_vm8 = vcmp.eq.f32.partialorder %v164_v47, 0.0 }
 0x1f3   :  { %300 = vrsqrt.f32 %v151_v48  ;;  %vm154_vm9 = vcmp.eq.f32.partialorder %v151_v48, inf  ;;  %v157_v55 = vand.u32 2147483648, %v151_v48  ;;  %vm156_vm10 = vcmp.eq.f32.partialorder %v151_v48, 0.0 }
 0x1fc   :  { %v299_v49 = vpop.eup %298 }
 0x1fd   :  { %v301_v50 = vpop.eup %300  ;;  %v166_v51 = vmul.f32 %v299_v49, %v164_v47 }
 0x1fe   :  { %v153_v53 = vmul.f32 %v301_v50, %v151_v48 }
 0x1ff   :  { %v168_v54 = vsel %vm167_vm7, %v164_v47, %v166_v51 }
 0x200   :  { %v171_v56 = vsel %vm169_vm8, %v170_v52, %v168_v54  ;;  %v155_v57 = vsel %vm154_vm9, %v151_v48, %v153_v53 }
 0x201   :  { %v158_v58 = vsel %vm156_vm10, %v157_v55, %v155_v57 }
 0x202   :  { %v172_v59 = vsub.f32 %v158_v58, %v171_v56 }
 0x204   :  { %v173_v60 = vadd.f32 1.0, %v172_v59 }
 0x206   :  { %v174_v62 = vmax.f32 %v173_v60, 0.0 }
 0x208   :  { %v176_v63 = vmul.f32 %v175_v61, %v174_v62 }
 0x20a   :  { %v178_v0 = vsel %vm177_vm11, %v176_v63, 0.0 }
 0x20b   :  { %v179_v1 = vrot.slane %v178_v0, 4 }
 0x20d   :  { %v180_v2 = vadd.f32 %v179_v1, %v178_v0 }
 0x20f   :  { %v181_v3 = vrot.slane %v180_v2, 2 }
 0x211   :  { %v182_v4 = vadd.f32 %v181_v3, %v180_v2 }
 0x213   :  { %v183_v5 = vrot.slane %v182_v4, 1 }
 0x215   :  { %v184_v6 = vadd.f32 %v183_v5, %v182_v4 }
 0x217   :  { %186 = vst.msk [vmem:[#allocation2] sm:$0x1] %vm185_vm12, %v184_v6 }
 0x218   :  { %313 = shalt.err (!%p310_p4)
}
 0x219   :  { %s314_s22 = scalar_lea.hbm %s420_s3, 16 }
 0x21a   :  { %p315_p5 = scmp.ne.s32.totalorder %s420_s3, %s314_s22  ;;  %p318_p6 = scmp.lt.u32.totalorder %s314_s22, %s420_s3 }
 0x21c   :  { %p320_p7 = pnand %p318_p6, %p315_p5 }
 0x21e   :  { %323 = shalt.err (!%p320_p7)
}
 0x21f   :  { %196 = dma.vmem_to_hbm [thread:$0]  %s194_s18, 16, %s420_s3, [#allocation3]  }
 0x220   :  { %324 = dma.done.wait [#allocation3], 16  }
 0x221   :  { %325 = vsyncadd [#allocation3], 4294967280 }
 0x222   :  { %200 = vsyncpa [#allocation3], 1 }

</bundles_post_ra>
